<compile_context>
chip_gen: v7x
topology: tpu7x:2x2x1
jax: 0.10.0
libtpu: 0.0.40
codegen_flags: <defaults>
</compile_context>

<pallas_src>
import jax
import jax.numpy as jnp
from jax.experimental import pallas as pl
from jax.experimental.pallas import tpu as pltpu

ACTION_SIZE = 3
EMBEDDING_SIZE = 50

_MAX_BB = 1 << 16        # max rows (lanes) per tile: ~3 MiB of VMEM per buffer set
_SMALL_BATCH = 1024      # below this, an XLA fusion beats any kernel launch


# ---------------------------------------------------------------------------
# Kernel  (lane-dense: batch on the 128-lane axis)
# ---------------------------------------------------------------------------
def policy_kernel(w_ref, x_ref, idx_ref, out_ref):
    """w_ref:   SMEM (27,) f32  -- [A4 (4x3), A1 (1x3), b_f (3), ES (3x3)], row-major
       x_ref:   VMEM (8, bb) f32 -- rows 0..3 four features, row 4 income, rows 5..7 pad
       idx_ref: VMEM (1, bb) i32 -- status + 1, in {0, 1, 2}
       out_ref: VMEM (3, bb) f32 -- softmax action probabilities (one action per row)
    """
    f32 = jnp.float32

    idx = idx_ref[...]                              # (1, bb) int32
    m1 = (idx >= 1).astype(f32)                     # (1, bb)
    m2 = (idx >= 2).astype(f32)                     # (1, bb)

    x0 = x_ref[0:1, :]
    x1 = x_ref[1:2, :]
    x2 = x_ref[2:3, :]
    x3 = x_ref[3:4, :]
    xi = x_ref[4:5, :]                              # income

    def logit(j):
        # folded four-feature linear + income linear + bias (all SMEM scalars)
        acc = (x0 * w_ref[0 + j] + x1 * w_ref[3 + j]
               + x2 * w_ref[6 + j] + x3 * w_ref[9 + j]
               + xi * w_ref[12 + j])
        es0 = w_ref[18 + j]
        es1 = w_ref[21 + j]
        es2 = w_ref[24 + j]
        # status embedding folded through the policy head, as a VPU select-free sum
        acc = acc + (w_ref[15 + j] + es0)
        acc = acc + m1 * (es1 - es0) + m2 * (es2 - es1)
        return acc                                   # (1, bb)

    l0 = logit(0)
    l1 = logit(1)
    l2 = logit(2)

    # softmax over the 3 actions; exact divide (probs feed sampling / log-probs)
    m = jnp.maximum(jnp.maximum(l0, l1), l2)
    e0 = jnp.exp(l0 - m)
    e1 = jnp.exp(l1 - m)
    e2 = jnp.exp(l2 - m)
    denom = e0 + e1 + e2
    out_ref[0:1, :] = e0 / denom
    out_ref[1:2, :] = e1 / denom
    out_ref[2:3, :] = e2 / denom


# ---------------------------------------------------------------------------
# Parameters (PyTorch shape conventions) and weight folding
# ---------------------------------------------------------------------------
def init_params(key):
    """Deterministic synthetic parameters, PyTorch shape conventions."""
    ks = jax.random.split(key, 7)
    return {
        # nn.Linear(1, 50): weight (50, 1), bias (50,)
        "w_inc": jax.random.normal(ks[0], (EMBEDDING_SIZE, 1), jnp.float32) * 0.1,
        "b_inc": jax.random.normal(ks[1], (EMBEDDING_SIZE,), jnp.float32) * 0.1,
        # nn.Embedding(3, 50): weight (3, 50)
        "emb": jax.random.normal(ks[2], (3, EMBEDDING_SIZE), jnp.float32) * 0.1,
        # nn.Linear(4, 50): weight (50, 4), bias (50,)
        "w_four": jax.random.normal(ks[3], (EMBEDDING_SIZE, 4), jnp.float32) * 0.1,
        "b_four": jax.random.normal(ks[4], (EMBEDDING_SIZE,), jnp.float32) * 0.1,
        # nn.Linear(150, 3): weight (3, 150), bias (3,)
        "w_pol": jax.random.normal(ks[5], (ACTION_SIZE, 3 * EMBEDDING_SIZE), jnp.float32) * 0.1,
        "b_pol": jax.random.normal(ks[6], (ACTION_SIZE,), jnp.float32) * 0.1,
    }


def fold_params(params):
    """Fold the two linears + embedding through the policy head (weight-only, once).

    Returns a flat (27,) f32 vector, row-major:
      [ A4 (4x3) | A1 (1x3) | b_f (3) | ES (3x3) ]
    """
    w4t = params["w_four"].T                                  # (4, 50)
    w1t = params["w_inc"].T                                   # (1, 50)
    wpt = params["w_pol"].T                                   # (150, 3)
    wp4 = wpt[0 * EMBEDDING_SIZE:1 * EMBEDDING_SIZE, :]       # (50, 3)
    wps = wpt[1 * EMBEDDING_SIZE:2 * EMBEDDING_SIZE, :]       # (50, 3)
    wp1 = wpt[2 * EMBEDDING_SIZE:3 * EMBEDDING_SIZE, :]       # (50, 3)

    a4 = w4t @ wp4                                            # (4, 3)
    a1 = w1t @ wp1                                            # (1, 3)
    es = params["emb"] @ wps                                  # (3, 3)
    b_f = params["b_four"] @ wp4 + params["b_inc"] @ wp1 + params["b_pol"]   # (3,)

    return jnp.concatenate(
        [a4.reshape(-1), a1.reshape(-1), b_f.reshape(-1), es.reshape(-1)]
    ).astype(jnp.float32)                                     # (27,)


# ---------------------------------------------------------------------------
# Wrappers
# ---------------------------------------------------------------------------
def _plan(batch):
    """Padded batch and lane-block size: multiples of 128, grid >= 2 (megacore)."""
    b_pad = -(-batch // 256) * 256                   # multiple of 256
    if b_pad <= 2 * _MAX_BB:
        bb = b_pad // 2                              # grid = 2, bb multiple of 128
    else:
        bb = _MAX_BB
        b_pad = -(-b_pad // bb) * bb
    return b_pad, bb


def _policy_forward_jnp(four, status, income, w_flat):
    """Small-batch fast path: the folded expression as a plain XLA fusion."""
    idx = status.astype(jnp.int32) + 1
    a4 = w_flat[0:12].reshape(4, 3)
    a1 = w_flat[12:15].reshape(1, 3)
    b_f = w_flat[15:18]
    es = w_flat[18:27].reshape(3, 3)
    logits = four.astype(jnp.float32) @ a4 + income.astype(jnp.float32) @ a1 + b_f + es[idx]
    return jax.nn.softmax(logits, axis=-1)


def _policy_forward_pallas(four, status, income, w_flat):
    batch = four.shape[0]
    b_pad, bb = _plan(batch)

    # Lane-dense packing: one transpose in the wrapper, batch on the lane axis.
    # TODO(synk): on v6e/v7x the activations could be streamed as bf16 (math in
    # f32) to halve HBM traffic; kept f32 end-to-end for v5e and bit-cleanliness.
    x = jnp.zeros((8, b_pad), jnp.float32)
    x = x.at[0:4, :batch].set(four.astype(jnp.float32).T)
    x = x.at[4:5, :batch].set(income.astype(jnp.float32).T)
    idx = jnp.zeros((1, b_pad), jnp.int32)
    idx = idx.at[0, :batch].set(status.astype(jnp.int32) + 1)
    # TODO(synk): PyTorch nn.Embedding raises on out-of-range status; here any
    # out-of-range status clamps into the folded embedding rows.

    out = pl.pallas_call(
        policy_kernel,
        out_shape=jax.ShapeDtypeStruct((3, b_pad), jnp.float32),
        grid_spec=pltpu.PrefetchScalarGridSpec(
            num_scalar_prefetch=1,                              # w_flat -> SMEM scalars
            grid=(b_pad // bb,),
            in_specs=[
                pl.BlockSpec((8, bb), lambda i, w: (0, i)),     # activations
                pl.BlockSpec((1, bb), lambda i, w: (0, i)),     # status index
            ],
            out_specs=pl.BlockSpec((3, bb), lambda i, w: (0, i)),
        ),
        compiler_params=pltpu.CompilerParams(
            dimension_semantics=("parallel",)),                 # megacore on v7x
    )(w_flat, x, idx)

    return out[:, :batch].T                                     # (B, 3)


def policy_forward(four, status, income, w_flat, *, force_pallas=False):
    """Batched Policy.forward.

    four:   (B, 4) f32
    status: (B,)   int in {-1, 0, 1}
    income: (B, 1) f32 (or (B,))
    w_flat: (27,)  f32 from fold_params()
    returns (B, 3) softmax action probabilities (B=1 == the PyTorch module).
    """
    batch = four.shape[0]
    income = income.reshape(batch, 1)
    status = status.reshape(batch)
    if batch < _SMALL_BATCH and not force_pallas:
        return _policy_forward_jnp(four, status, income, w_flat)
    return _policy_forward_pallas(four, status, income, w_flat)


# ---------------------------------------------------------------------------
# Pure-JAX reference of the PyTorch forward (unfolded)
# ---------------------------------------------------------------------------
def policy_forward_ref(four, status, income, params):
    idx = status.astype(jnp.int32) + 1                           # (B,)
    four_e = four @ params["w_four"].T + params["b_four"]        # (B, 50)
    inc_e = income @ params["w_inc"].T + params["b_inc"]         # (B, 50)
    stat_e = params["emb"][idx]                                  # (B, 50)
    total = jnp.concatenate([four_e, stat_e, inc_e], axis=1)     # (B, 150)
    logits = total @ params["w_pol"].T + params["b_pol"]         # (B, 3)
    return jax.nn.softmax(logits, axis=-1)


if __name__ == "__main__":
    key = jax.random.PRNGKey(0)
    pkey, fkey, ikey, skey = jax.random.split(key, 4)

    params = init_params(pkey)
    w_flat = fold_params(params)        # weight-only precompute, done once

    B = 8
    four = jax.random.normal(fkey, (B, 4), jnp.float32)
    income = jax.random.normal(ikey, (B, 1), jnp.float32)
    status = jax.random.randint(skey, (B,), -1, 2).astype(jnp.int32)   # {-1, 0, 1}

    ref = policy_forward_ref(four, status, income, params)

    # Small-batch fast path (default dispatch at B=8)
    out_fast = jax.block_until_ready(policy_forward(four, status, income, w_flat))
    assert out_fast.shape == (B, ACTION_SIZE)
    assert jnp.allclose(out_fast, ref, atol=1e-4, rtol=1e-4), (out_fast, ref)

    # Same inputs forced through the Pallas kernel (exercises padding + grid of 2)
    out_pl = jax.block_until_ready(
        policy_forward(four, status, income, w_flat, force_pallas=True))
    assert out_pl.shape == (B, ACTION_SIZE)
    assert jnp.allclose(out_pl, ref, atol=1e-4, rtol=1e-4), (out_pl, ref)
    assert jnp.allclose(jnp.sum(out_pl, axis=-1), 1.0, atol=1e-4)

    # B = 1: the module's native call shape, through the kernel
    o1 = jax.block_until_ready(
        policy_forward(four[:1], status[:1], income[:1], w_flat, force_pallas=True))
    r1 = policy_forward_ref(four[:1], status[:1], income[:1], params)
    assert o1.shape == (1, ACTION_SIZE)
    assert jnp.allclose(o1, r1, atol=1e-4, rtol=1e-4), (o1, r1)

    print("KERNEL_OK")
</pallas_src>

<mosaic_0001>
module attributes {stable_mosaic.version = 11 : i64} {
  func.func @policy_kernel(%arg0: i32, %arg1: memref<27xf32, #tpu.memory_space<smem>>, %arg2: memref<8x128xf32, #tpu.memory_space<vmem>>, %arg3: memref<1x128xi32, #tpu.memory_space<vmem>>, %arg4: memref<3x128xf32, #tpu.memory_space<vmem>>) attributes {dimension_semantics = [#tpu.dimension_semantics<parallel>], iteration_bounds = array<i64: 2>, scalar_prefetch = 1 : i64, scratch_operands = 0 : i64, tpu.core_type = #tpu.core_type<tc>, window_params = [{transform_indices = @transform_0, window_bounds = array<i64: 8, 128>}, {transform_indices = @transform_1, window_bounds = array<i64: 1, 128>}, {transform_indices = @transform_2, window_bounds = array<i64: 3, 128>}]} {
    %c0 = arith.constant 0 : index
    %c0_0 = arith.constant 0 : index
    %0 = vector.load %arg3[%c0, %c0_0] : memref<1x128xi32, #tpu.memory_space<vmem>>, vector<1x128xi32>
    %c1_i32 = arith.constant 1 : i32
    %1 = vector.broadcast %c1_i32 : i32 to vector<1x128xi32>
    %2 = arith.cmpi sge, %0, %1 : vector<1x128xi32>
    %3 = arith.extui %2 : vector<1x128xi1> to vector<1x128xi32>
    %4 = arith.sitofp %3 : vector<1x128xi32> to vector<1x128xf32>
    %c2_i32 = arith.constant 2 : i32
    %5 = vector.broadcast %c2_i32 : i32 to vector<1x128xi32>
    %6 = arith.cmpi sge, %0, %5 : vector<1x128xi32>
    %7 = arith.extui %6 : vector<1x128xi1> to vector<1x128xi32>
    %8 = arith.sitofp %7 : vector<1x128xi32> to vector<1x128xf32>
    %c0_1 = arith.constant 0 : index
    %c0_2 = arith.constant 0 : index
    %9 = vector.load %arg2[%c0_1, %c0_2] : memref<8x128xf32, #tpu.memory_space<vmem>>, vector<1x128xf32>
    %c1 = arith.constant 1 : index
    %c0_3 = arith.constant 0 : index
    %10 = vector.load %arg2[%c1, %c0_3] : memref<8x128xf32, #tpu.memory_space<vmem>>, vector<1x128xf32>
    %c2 = arith.constant 2 : index
    %c0_4 = arith.constant 0 : index
    %11 = vector.load %arg2[%c2, %c0_4] : memref<8x128xf32, #tpu.memory_space<vmem>>, vector<1x128xf32>
    %c3 = arith.constant 3 : index
    %c0_5 = arith.constant 0 : index
    %12 = vector.load %arg2[%c3, %c0_5] : memref<8x128xf32, #tpu.memory_space<vmem>>, vector<1x128xf32>
    %c4 = arith.constant 4 : index
    %c0_6 = arith.constant 0 : index
    %13 = vector.load %arg2[%c4, %c0_6] : memref<8x128xf32, #tpu.memory_space<vmem>>, vector<1x128xf32>
    %c0_7 = arith.constant 0 : index
    %14 = memref.load %arg1[%c0_7] : memref<27xf32, #tpu.memory_space<smem>>
    %15 = vector.broadcast %14 : f32 to vector<1x128xf32>
    %16 = arith.mulf %9, %15 : vector<1x128xf32>
    %c3_8 = arith.constant 3 : index
    %17 = memref.load %arg1[%c3_8] : memref<27xf32, #tpu.memory_space<smem>>
    %18 = vector.broadcast %17 : f32 to vector<1x128xf32>
    %19 = arith.mulf %10, %18 : vector<1x128xf32>
    %20 = arith.addf %16, %19 : vector<1x128xf32>
    %c6 = arith.constant 6 : index
    %21 = memref.load %arg1[%c6] : memref<27xf32, #tpu.memory_space<smem>>
    %22 = vector.broadcast %21 : f32 to vector<1x128xf32>
    %23 = arith.mulf %11, %22 : vector<1x128xf32>
    %24 = arith.addf %20, %23 : vector<1x128xf32>
    %c9 = arith.constant 9 : index
    %25 = memref.load %arg1[%c9] : memref<27xf32, #tpu.memory_space<smem>>
    %26 = vector.broadcast %25 : f32 to vector<1x128xf32>
    %27 = arith.mulf %12, %26 : vector<1x128xf32>
    %28 = arith.addf %24, %27 : vector<1x128xf32>
    %c12 = arith.constant 12 : index
    %29 = memref.load %arg1[%c12] : memref<27xf32, #tpu.memory_space<smem>>
    %30 = vector.broadcast %29 : f32 to vector<1x128xf32>
    %31 = arith.mulf %13, %30 : vector<1x128xf32>
    %32 = arith.addf %28, %31 : vector<1x128xf32>
    %c18 = arith.constant 18 : index
    %33 = memref.load %arg1[%c18] : memref<27xf32, #tpu.memory_space<smem>>
    %c21 = arith.constant 21 : index
    %34 = memref.load %arg1[%c21] : memref<27xf32, #tpu.memory_space<smem>>
    %c24 = arith.constant 24 : index
    %35 = memref.load %arg1[%c24] : memref<27xf32, #tpu.memory_space<smem>>
    %c15 = arith.constant 15 : index
    %36 = memref.load %arg1[%c15] : memref<27xf32, #tpu.memory_space<smem>>
    %37 = arith.addf %36, %33 : f32
    %38 = vector.broadcast %37 : f32 to vector<1x128xf32>
    %39 = arith.addf %32, %38 : vector<1x128xf32>
    %40 = arith.subf %34, %33 : f32
    %41 = vector.broadcast %40 : f32 to vector<1x128xf32>
    %42 = arith.mulf %4, %41 : vector<1x128xf32>
    %43 = arith.addf %39, %42 : vector<1x128xf32>
    %44 = arith.subf %35, %34 : f32
    %45 = vector.broadcast %44 : f32 to vector<1x128xf32>
    %46 = arith.mulf %8, %45 : vector<1x128xf32>
    %47 = arith.addf %43, %46 : vector<1x128xf32>
    %c1_9 = arith.constant 1 : index
    %48 = memref.load %arg1[%c1_9] : memref<27xf32, #tpu.memory_space<smem>>
    %49 = vector.broadcast %48 : f32 to vector<1x128xf32>
    %50 = arith.mulf %9, %49 : vector<1x128xf32>
    %c4_10 = arith.constant 4 : index
    %51 = memref.load %arg1[%c4_10] : memref<27xf32, #tpu.memory_space<smem>>
    %52 = vector.broadcast %51 : f32 to vector<1x128xf32>
    %53 = arith.mulf %10, %52 : vector<1x128xf32>
    %54 = arith.addf %50, %53 : vector<1x128xf32>
    %c7 = arith.constant 7 : index
    %55 = memref.load %arg1[%c7] : memref<27xf32, #tpu.memory_space<smem>>
    %56 = vector.broadcast %55 : f32 to vector<1x128xf32>
    %57 = arith.mulf %11, %56 : vector<1x128xf32>
    %58 = arith.addf %54, %57 : vector<1x128xf32>
    %c10 = arith.constant 10 : index
    %59 = memref.load %arg1[%c10] : memref<27xf32, #tpu.memory_space<smem>>
    %60 = vector.broadcast %59 : f32 to vector<1x128xf32>
    %61 = arith.mulf %12, %60 : vector<1x128xf32>
    %62 = arith.addf %58, %61 : vector<1x128xf32>
    %c13 = arith.constant 13 : index
    %63 = memref.load %arg1[%c13] : memref<27xf32, #tpu.memory_space<smem>>
    %64 = vector.broadcast %63 : f32 to vector<1x128xf32>
    %65 = arith.mulf %13, %64 : vector<1x128xf32>
    %66 = arith.addf %62, %65 : vector<1x128xf32>
    %c19 = arith.constant 19 : index
    %67 = memref.load %arg1[%c19] : memref<27xf32, #tpu.memory_space<smem>>
    %c22 = arith.constant 22 : index
    %68 = memref.load %arg1[%c22] : memref<27xf32, #tpu.memory_space<smem>>
    %c25 = arith.constant 25 : index
    %69 = memref.load %arg1[%c25] : memref<27xf32, #tpu.memory_space<smem>>
    %c16 = arith.constant 16 : index
    %70 = memref.load %arg1[%c16] : memref<27xf32, #tpu.memory_space<smem>>
    %71 = arith.addf %70, %67 : f32
    %72 = vector.broadcast %71 : f32 to vector<1x128xf32>
    %73 = arith.addf %66, %72 : vector<1x128xf32>
    %74 = arith.subf %68, %67 : f32
    %75 = vector.broadcast %74 : f32 to vector<1x128xf32>
    %76 = arith.mulf %4, %75 : vector<1x128xf32>
    %77 = arith.addf %73, %76 : vector<1x128xf32>
    %78 = arith.subf %69, %68 : f32
    %79 = vector.broadcast %78 : f32 to vector<1x128xf32>
    %80 = arith.mulf %8, %79 : vector<1x128xf32>
    %81 = arith.addf %77, %80 : vector<1x128xf32>
    %c2_11 = arith.constant 2 : index
    %82 = memref.load %arg1[%c2_11] : memref<27xf32, #tpu.memory_space<smem>>
    %83 = vector.broadcast %82 : f32 to vector<1x128xf32>
    %84 = arith.mulf %9, %83 : vector<1x128xf32>
    %c5 = arith.constant 5 : index
    %85 = memref.load %arg1[%c5] : memref<27xf32, #tpu.memory_space<smem>>
    %86 = vector.broadcast %85 : f32 to vector<1x128xf32>
    %87 = arith.mulf %10, %86 : vector<1x128xf32>
    %88 = arith.addf %84, %87 : vector<1x128xf32>
    %c8 = arith.constant 8 : index
    %89 = memref.load %arg1[%c8] : memref<27xf32, #tpu.memory_space<smem>>
    %90 = vector.broadcast %89 : f32 to vector<1x128xf32>
    %91 = arith.mulf %11, %90 : vector<1x128xf32>
    %92 = arith.addf %88, %91 : vector<1x128xf32>
    %c11 = arith.constant 11 : index
    %93 = memref.load %arg1[%c11] : memref<27xf32, #tpu.memory_space<smem>>
    %94 = vector.broadcast %93 : f32 to vector<1x128xf32>
    %95 = arith.mulf %12, %94 : vector<1x128xf32>
    %96 = arith.addf %92, %95 : vector<1x128xf32>
    %c14 = arith.constant 14 : index
    %97 = memref.load %arg1[%c14] : memref<27xf32, #tpu.memory_space<smem>>
    %98 = vector.broadcast %97 : f32 to vector<1x128xf32>
    %99 = arith.mulf %13, %98 : vector<1x128xf32>
    %100 = arith.addf %96, %99 : vector<1x128xf32>
    %c20 = arith.constant 20 : index
    %101 = memref.load %arg1[%c20] : memref<27xf32, #tpu.memory_space<smem>>
    %c23 = arith.constant 23 : index
    %102 = memref.load %arg1[%c23] : memref<27xf32, #tpu.memory_space<smem>>
    %c26 = arith.constant 26 : index
    %103 = memref.load %arg1[%c26] : memref<27xf32, #tpu.memory_space<smem>>
    %c17 = arith.constant 17 : index
    %104 = memref.load %arg1[%c17] : memref<27xf32, #tpu.memory_space<smem>>
    %105 = arith.addf %104, %101 : f32
    %106 = vector.broadcast %105 : f32 to vector<1x128xf32>
    %107 = arith.addf %100, %106 : vector<1x128xf32>
    %108 = arith.subf %102, %101 : f32
    %109 = vector.broadcast %108 : f32 to vector<1x128xf32>
    %110 = arith.mulf %4, %109 : vector<1x128xf32>
    %111 = arith.addf %107, %110 : vector<1x128xf32>
    %112 = arith.subf %103, %102 : f32
    %113 = vector.broadcast %112 : f32 to vector<1x128xf32>
    %114 = arith.mulf %8, %113 : vector<1x128xf32>
    %115 = arith.addf %111, %114 : vector<1x128xf32>
    %116 = arith.maximumf %47, %81 : vector<1x128xf32>
    %117 = arith.maximumf %116, %115 : vector<1x128xf32>
    %118 = arith.subf %47, %117 : vector<1x128xf32>
    %119 = math.exp %118 : vector<1x128xf32>
    %120 = arith.subf %81, %117 : vector<1x128xf32>
    %121 = math.exp %120 : vector<1x128xf32>
    %122 = arith.subf %115, %117 : vector<1x128xf32>
    %123 = math.exp %122 : vector<1x128xf32>
    %124 = arith.addf %119, %121 : vector<1x128xf32>
    %125 = arith.addf %124, %123 : vector<1x128xf32>
    %126 = arith.divf %119, %125 : vector<1x128xf32>
    %c0_12 = arith.constant 0 : index
    %c0_13 = arith.constant 0 : index
    %127 = vector.load %arg4[%c0_12, %c0_13] : memref<3x128xf32, #tpu.memory_space<vmem>>, vector<1x128xf32>
    tpu.vector_store %arg4[%c0_12, %c0_13], %126 {strides = array<i32>} : memref<3x128xf32, #tpu.memory_space<vmem>>, vector<1x128xf32>,
    %128 = arith.divf %121, %125 : vector<1x128xf32>
    %c1_14 = arith.constant 1 : index
    %c0_15 = arith.constant 0 : index
    %129 = vector.load %arg4[%c1_14, %c0_15] : memref<3x128xf32, #tpu.memory_space<vmem>>, vector<1x128xf32>
    tpu.vector_store %arg4[%c1_14, %c0_15], %128 {strides = array<i32>} : memref<3x128xf32, #tpu.memory_space<vmem>>, vector<1x128xf32>,
    %130 = arith.divf %123, %125 : vector<1x128xf32>
    %c2_16 = arith.constant 2 : index
    %c0_17 = arith.constant 0 : index
    %131 = vector.load %arg4[%c2_16, %c0_17] : memref<3x128xf32, #tpu.memory_space<vmem>>, vector<1x128xf32>
    tpu.vector_store %arg4[%c2_16, %c0_17], %130 {strides = array<i32>} : memref<3x128xf32, #tpu.memory_space<vmem>>, vector<1x128xf32>,
    return
  }
  func.func @transform_0(%arg0: i32, %arg1: memref<27xf32, #tpu.memory_space<smem>>) -> (i32, i32) {
    %c0_i32 = arith.constant 0 : i32
    %c0_i32_0 = arith.constant 0 : i32
    return %c0_i32, %arg0 : i32, i32
  }
  func.func @transform_1(%arg0: i32, %arg1: memref<27xf32, #tpu.memory_space<smem>>) -> (i32, i32) {
    %c0_i32 = arith.constant 0 : i32
    %c0_i32_0 = arith.constant 0 : i32
    return %c0_i32, %arg0 : i32, i32
  }
  func.func @transform_2(%arg0: i32, %arg1: memref<27xf32, #tpu.memory_space<smem>>) -> (i32, i32) {
    %c0_i32 = arith.constant 0 : i32
    %c0_i32_0 = arith.constant 0 : i32
    return %c0_i32, %arg0 : i32, i32
  }
}

</mosaic_0001>

<bundles_post_ra>
// kernel: tpu_custom_call.1
= control target key start
LH: loop header
LB: loop body
LE: loop exit
PB: predicated region body
PF: predicated region fallthrough
CT: control target
= control target key end

     0   :  { %s920_s0 = inlined_call_operand.hbm [shape: f32[27], index: 0, kind: input, shape index: {}]   ;;  %s921_s1 = inlined_call_operand.hbm [shape: f32[8,256], index: 1, kind: input, shape index: {}]   ;;  %s922_s2 = inlined_call_operand.vmem [shape: s32[1,256], index: 2, kind: input, shape index: {}]   ;;  %s923_s3 = inlined_call_operand.hbm [shape: f32[3,256], index: 3, kind: output, shape index: {}]  }
   0x1   :  { %925 = sst [smem:[#allocation11_spill]] %s921_s1  ;;  %s501_s14 = scalar_lea.hbm %s920_s0, 16 }
   0x2   :  { %p502_p0 = scmp.ne.s32.totalorder %s920_s0, %s501_s14  ;;  %p505_p1 = scmp.lt.u32.totalorder %s501_s14, %s920_s0 }
   0x4   :  { %p507_p2 = pnand %p505_p1, %p502_p0 }
   0x6   :  { %510 = shalt.err (!%p507_p2)  }
   0x7   :  { %s611_s19 = smov [#allocation3]  }
   0x8   :  { %9 = dma.hbm_to_smem %s920_s0, 16, %s611_s19, [#allocation2] }
   0x9   :  { %585 = dma.done.wait [#allocation2], 16 }
   0xa   :  { %586 = vsyncadd [#allocation2], 4294967280 }
   0xb   :  { %11 = sfence }
   0xc   :  { %12 = vsyncpa [#allocation5], 0 }
   0xd   :  { %14 = vsyncpa [#allocation5 + $0x1], 0 }
   0xe   :  { %15 = vsyncpa [#allocation6], 0 }
   0xf   :  { %17 = vsyncpa [#allocation6 + $0x1], 0  ;;  %s647_s22 = smov 0   ;;  %s649_s23 = smov 0  }
  0x10   :  { %s651_s24 = smov 0   ;;  %s653_s25 = smov 0  }
  0x11 LB: > { %s668_s0 = sadd.s32 4294967295, %s609_s25   ;;  %s405_s26 = sadd.s32 4294967294, %s609_s25   ;;  %s609_s25 = sphi %s653_s25, %s941_s25   ;;  %s605_s24 = sphi %s651_s24, %s940_s24   ;;  %s601_s23 = sphi %s649_s23, %s939_s23   ;;  %s597_s22 = sphi %s647_s22, %s938_s22  }
  0x12   : > { %s672_s27 = sadd.s32 1, %s609_s25   ;;  %s30_s28 = sadd.s32 1, %s605_s24 }
  0x13   : > { %s27_s29 = ssub.s32 %s609_s25, %s672_s27  ;;  %p37_p3 = scmp.ne.s32.totalorder %s605_s24, %s601_s23 }
  0x14   : > { %p28_p4 = scmp.eq.s32.totalorder %s27_s29, 0  ;;  %p38_p5 = scmp.eq.s32.totalorder %s609_s25, 0 }
  0x15   : > { %p43_p6 = scmp.ne.s32.totalorder %s601_s23, %s597_s22  ;;  %p44_p7 = scmp.eq.s32.totalorder %s668_s0, 0 }
  0x16   : > { %s684_s30 = scalar_select %p28_p4, %s605_s24, %s30_s28  }
  0x17   : > { %p686_p8 = por %p38_p5, %p37_p3  ;;  %p690_p9 = por %p44_p7, %p43_p6 }
  0x18   : > { %p93_p10 = scmp.eq.s32.totalorder %s668_s0, 1  ;;  %p99_p11 = scmp.eq.s32.totalorder %s405_s26, 1 }
  0x19   : > { %p457_p13 = scmp.lt.s32.totalorder %s609_s25, 2  ;;  %s119_s8 = sand.u32 1, %s605_s24  }
  0x1a   : > { %p697_p0 = por %p93_p10, %p37_p3  ;;  %p701_p1 = por %p99_p11, %p43_p6 }
  0x1b   : > { %s409_s9 = sshll.u32 %s609_s25, 7  ;;  %s408_s10 = sshll.u32 %s119_s8, 3 }
  0x1c   : > { %s928_s6 = scalar_select %p697_p0, 1, 0 }
  0x1d   : > { %s929_s7 = scalar_select %p701_p1, 1, 0 }
  0x1e   : > { %s930_s1 = sld [smem:[#allocation11_spill]]  ;;  %s123_s14 = scalar_lea.vmem [#allocation4], %s408_s10 }
  0x1f   : > { %s130_s15 = sshll.u32 %s123_s14, 4  ;;  %p714_p2 = pnand %p457_p13, %p686_p8  ;;  %s718_s15 = int_to_ptr.vmem [resolvable:$true] %s130_s15 }
  0x20   : > { %s120_s17 = scalar_lea.sflag [#allocation5], %s119_s8 }
  0x21   : > { %p513_p6 = pneg %p714_p2 }
  0x24   : > { %s710_s13 = scalar_lea.hbm %s930_s1, %s409_s9  ;;  %s516_s21 = scalar_lea.hbm %s930_s1, 256 }
  0x25   : > { %s511_s18 = scalar_lea.hbm %s710_s13, 128  ;;  %p517_p8 = scmp.lt.u32.totalorder %s710_s13, %s930_s1 }
  0x26   : > { %p512_p5 = scmp.ne.s32.totalorder %s710_s13, %s511_s18  ;;  %p518_p11 = scmp.lt.u32.totalorder %s516_s21, %s511_s18 }
  0x27   : > { %p520_p12 = scmp.lt.u32.totalorder %s511_s18, %s710_s13 }
  0x28   : > { %p514_p7 = pnand %p513_p6, %p512_p5  ;;  %p519_p13 = por %p518_p11, %p517_p8 }
  0x2a   : > { %p515_p10 = pneg %p514_p7  ;;  %p521_p3 = por %p520_p12, %p519_p13 }
  0x2c   : > { %p522_p4 = pnand %p521_p3, %p515_p10 }
  0x2e   : > { %525 = shalt.err (!%p522_p4)
}
  0x2f   : > { %s526_s29 = scalar_lea.vmem %s718_s15, 128  ;;  %s612_s4 = smov [#allocation4]  }
  0x30   : > { %p527_p5 = scmp.ne.s32.totalorder %s718_s15, %s526_s29  ;;  %s531_s8 = sshll.u32 %s612_s4, 4  ;;  %s532_s8 = int_to_ptr.vmem [resolvable:$false] %s531_s8 }
  0x31   : > { %s533_s9 = scalar_lea.vmem %s532_s8, 256  ;;  %p534_p0 = scmp.lt.s32.totalorder %s718_s15, %s532_s8 }
  0x32   : > { %p529_p7 = pnand %p527_p5, %p513_p6  ;;  %p535_p8 = scmp.lt.s32.totalorder %s533_s9, %s526_s29 }
  0x34   : > { %p530_p1 = pneg %p529_p7  ;;  %p536_p11 = por %p535_p8, %p534_p0 }
  0x36   : > { %p537_p12 = pnand %p536_p11, %p530_p1 }
  0x38   : > { %540 = shalt.err (!%p537_p12)
}
  0x39   : > { %452 = dma.hbm_to_vmem [thread:$0]  (!%p714_p2), %s710_s13, 128, %s718_s15, %s120_s17  }
  0x3a   : > { %p932_p3 = scmp.lt.s32.totalorder %s609_s25, 3  ;;  %p933_p4 = scmp.ge.s32.totalorder %s609_s25, 1 }
  0x3c   : > { %p142_p6 = pnand %p933_p4, %p932_p3 }
  0x3d   : > { %s752_s10 = sand.u32 (!%p142_p6), 1, %s601_s23  }
  0x3e   : > { %145 = sbr.rel (%p142_p6) target bundleno = 155 (0x9b), region = 28  ;;  %s411_s11 = sshll.u32 (!%p142_p6), %s752_s10, 3 }
  0x3f   : > { %s148_s12 = scalar_lea.sflag (!%p142_p6), [#allocation5], %s752_s10  ;;  %s756_s14 = scalar_lea.vmem (!%p142_p6), [#allocation4], %s411_s11 }
  0x45   : > { %588 = dma.done.wait (%p690_p9), %s148_s12, 128  }
  0x46   : > { %590 = vsyncadd (%p690_p9), %s148_s12, 4294967168  ;;  %p175_p0 = scmp.lt.s32.totalorder %s668_s0, 1  ;;  %s190_s13 = sld [smem:[#allocation3]]  ;;  %v773_v0 = vld [vmem:[%s756_s14] sm:$0x1]  ;;  %v613_v24 = vmov 0.0  }
  0x47   : > { %s415_s16 = sld [smem:[#allocation3 + $0x3]]  ;;  %s416_s17 = sld [smem:[#allocation3 + $0x6]]  ;;  %v776_v1 = vld [vmem:[%s756_s14 + $0x1] sm:$0x1]  ;;  %v779_v3 = vld [vmem:[%s756_s14 + $0x2] sm:$0x1] }
  0x48   : > { %s176_s15 = scalar_select %p175_p0, %s668_s0, 1  ;;  %v786_v5 = vld [vmem:[%s756_s14 + $0x3] sm:$0x1]  ;;  %v797_v12 = vld [vmem:[%s756_s14 + $0x4] sm:$0x1] }
  0x49   : > { %s417_s18 = sld [smem:[#allocation3 + $0x9]]  ;;  %s764_s19 = sld [smem:[#allocation3 + $0xc]] }
  0x4a   : > { %s766_s20 = sld [smem:[#allocation3 + $0x12]]  ;;  %s768_s21 = sld [smem:[#allocation3 + $0x15]] }
  0x4b   : > { %s770_s5 = sld [smem:[#allocation3 + $0x18]]  ;;  %s177_s29 = scalar_lea.vmem %s922_s2, %s176_s15 }
  0x4c   : > { %v191_v2 = vstv %s190_s13  ;;  %s788_s4 = sld [smem:[#allocation3 + $0xf]]  ;;  %s423_s8 = sld [smem:[#allocation3 + $0x1]]  ;;  %v178_v11 = vld [vmem:[%s177_s29] sm:$0x1] }
  0x4d   : > { %v192_v4 = vmul.f32 %v191_v2, %v773_v0  ;;  %v194_v6 = vstv %s415_s16  ;;  %v198_v7 = vstv %s416_s17  ;;  %s424_s9 = sld [smem:[#allocation3 + $0x4]]  ;;  %s792_s11 = sld [smem:[#allocation3 + $0x7]]  ;;  %vm179_vm0 = vcmp.ge.s32.totalorder %v178_v11, 1 }
  0x4e   : > { %v195_v8 = vmul.f32 %v194_v6, %v776_v1  ;;  %v199_v9 = vmul.f32 %v198_v7, %v779_v3  ;;  %s794_s12 = sld [smem:[#allocation3 + $0xa]]  ;;  %s803_s15 = sld [smem:[#allocation3 + $0xd]]  ;;  %vm182_vm1 = vcmp.ge.s32.totalorder %v178_v11, 2  ;;  %v413_v25 = vsel %vm179_vm0, 1.0, %v613_v24 }
  0x4f   : > { %v202_v10 = vstv %s417_s18  ;;  %v206_v15 = vstv %s764_s19  ;;  %s807_s17 = sld [smem:[#allocation3 + $0x13]]  ;;  %s809_s18 = sld [smem:[#allocation3 + $0x16]]  ;;  %v414_v34 = vsel %vm182_vm1, 1.0, %v613_v24 }
  0x50   : > { %v196_v13 = vadd.f32 %v195_v8, %v192_v4  ;;  %v203_v14 = vmul.f32 %v202_v10, %v786_v5  ;;  %s216_s13 = ssub.f32 %s768_s21, %s766_s20  ;;  %s811_s26 = sld [smem:[#allocation3 + $0x19]]  ;;  %v207_v17 = vmul.f32 %v206_v15, %v797_v12 }
  0x51   : > { %s816_s28 = sld [smem:[#allocation3 + $0x10]]  ;;  %s818_s19 = sld [smem:[#allocation3 + $0x2]] }
  0x52   : > { %v200_v16 = vadd.f32 %v199_v9, %v196_v13  ;;  %s213_s14 = sadd.f32 %s788_s4, %s766_s20  ;;  %v225_v19 = vstv %s423_s8  ;;  %s820_s29 = sld [smem:[#allocation3 + $0x5]]  ;;  %v217_v30 = vstv %s216_s13 }
  0x53   : > { %v228_v20 = vstv %s424_s9  ;;  %v226_v21 = vmul.f32 %v225_v19, %v773_v0  ;;  %v232_v23 = vstv %s792_s11  ;;  %s825_s16 = sld [smem:[#allocation3 + $0x8]]  ;;  %s827_s20 = sld [smem:[#allocation3 + $0xb]]  ;;  %v218_v37 = vmul.f32 %v413_v25, %v217_v30 }
  0x54   : > { %v204_v18 = vadd.f32 %v203_v14, %v200_v16  ;;  %v229_v22 = vmul.f32 %v228_v20, %v776_v1  ;;  %v233_v26 = vmul.f32 %v232_v23, %v779_v3  ;;  %v236_v27 = vstv %s794_s12  ;;  %s833_s4 = sld [smem:[#allocation3 + $0xe]]  ;;  %s835_s8 = sld [smem:[#allocation3 + $0x14]] }
  0x55   : > { %v240_v28 = vstv %s803_s15  ;;  %v237_v32 = vmul.f32 %v236_v27, %v786_v5  ;;  %s838_s9 = sld [smem:[#allocation3 + $0x17]]  ;;  %s840_s11 = sld [smem:[#allocation3 + $0x1a]]  ;;  %v214_v33 = vstv %s213_s14 }
  0x56   : > { %v208_v29 = vadd.f32 %v207_v17, %v204_v18  ;;  %v230_v31 = vadd.f32 %v229_v22, %v226_v21  ;;  %s250_s12 = ssub.f32 %s809_s18, %s807_s17  ;;  %s844_s15 = sld [smem:[#allocation3 + $0x11]]  ;;  %v241_v36 = vmul.f32 %v240_v28, %v797_v12 }
  0x57   : > { %s247_s13 = sadd.f32 %s816_s28, %s807_s17  ;;  %v259_v39 = vstv %s818_s19  ;;  %p935_p1 = scmp.ne.s32.totalorder %s928_s6, 0 }
  0x58   : > { %v234_v35 = vadd.f32 %v233_v26, %v230_v31  ;;  %v251_v38 = vstv %s250_s12  ;;  %s254_s1 = ssub.f32 %s811_s26, %s809_s18  ;;  %v262_v40 = vstv %s820_s29  ;;  %v215_v41 = vadd.f32 %v214_v33, %v208_v29  ;;  %s442_s26 = sshll.u32 %s668_s0, 6 }
  0x59   : > { %s934_s14 = ssub.f32 %s770_s5, %s768_s21  ;;  %v260_v44 = vmul.f32 %v259_v39, %v773_v0  ;;  %v248_v45 = vstv %s247_s13  ;;  %v252_v46 = vmul.f32 %v413_v25, %v251_v38  ;;  %v263_v47 = vmul.f32 %v262_v40, %v776_v1  ;;  %s878_s29 = scalar_lea.hbm %s923_s3, %s442_s26 }
  0x5a   : > { %v238_v43 = vadd.f32 %v237_v32, %v234_v35  ;;  %v266_v48 = vstv %s825_s16  ;;  %v255_v50 = vstv %s254_s1  ;;  %v270_v52 = vstv %s827_s20  ;;  %s412_s1 = sshll.u32 %s752_s10, 2  ;;  %s313_s20 = scalar_lea.sflag [#allocation6], %s752_s10 }
  0x5b   : > { %v221_v42 = vstv %s934_s14  ;;  %v267_v51 = vmul.f32 %v266_v48, %v779_v3  ;;  %s284_s17 = ssub.f32 %s838_s9, %s835_s8  ;;  %v264_v53 = vadd.f32 %v263_v47, %v260_v44  ;;  %v271_v54 = vmul.f32 %v270_v52, %v786_v5  ;;  %s174_s16 = scalar_lea.vmem [#allocation7], %s412_s1 }
  0x5c   : > { %v242_v49 = vadd.f32 %v241_v36, %v238_v43  ;;  %v274_v55 = vstv %s833_s4  ;;  %s281_s21 = sadd.f32 %s844_s15, %s835_s8  ;;  %v222_v56 = vmul.f32 %v414_v34, %v221_v42  ;;  %v219_v58 = vadd.f32 %v218_v37, %v215_v41  ;;  %s326_s18 = sshll.u32 %s174_s16, 4  ;;  %s873_s18 = int_to_ptr.vmem [resolvable:$true] %s326_s18 }
  0x5d   : > { %s288_s5 = ssub.f32 %s840_s11, %s838_s9  ;;  %v256_v59 = vmul.f32 %v414_v34, %v255_v50  ;;  %v268_v60 = vadd.f32 %v267_v51, %v264_v53  ;;  %v275_v61 = vmul.f32 %v274_v55, %v797_v12  ;;  %v285_v63 = vstv %s284_s17  ;;  %s541_s4 = scalar_lea.vmem %s873_s18, 64 }
  0x5e   : > { %v249_v57 = vadd.f32 %v248_v45, %v242_v49  ;;  %v282_v1 = vstv %s281_s21  ;;  %v223_v3 = vadd.f32 %v222_v56, %v219_v58  ;;  %v286_v7 = vmul.f32 %v413_v25, %v285_v63  ;;  %p542_p9 = scmp.ne.s32.totalorder %s873_s18, %s541_s4  ;;  %s614_s0 = smov [#allocation7]  }
  0x5f   : > { %v272_v0 = vadd.f32 %v271_v54, %v268_v60  ;;  %v289_v2 = vstv %s288_s5  ;;  %s545_s8 = sshll.u32 %s614_s0, 4  ;;  %s546_s8 = int_to_ptr.vmem [resolvable:$false] %s545_s8 }
  0x60   : > { %v253_v62 = vadd.f32 %v252_v46, %v249_v57  ;;  %v290_v8 = vmul.f32 %v414_v34, %v289_v2  ;;  %p543_p2 = pnand %p542_p9, %p935_p1  ;;  %s547_s9 = scalar_lea.vmem %s546_s8, 128 }
  0x61   : > { %v276_v6 = vadd.f32 %v275_v61, %v272_v0  ;;  %p548_p13 = scmp.lt.s32.totalorder %s873_s18, %s546_s8  ;;  %p549_p5 = scmp.lt.s32.totalorder %s547_s9, %s541_s4 }
  0x62   : > { %v257_v4 = vadd.f32 %v256_v59, %v253_v62  ;;  %p544_p10 = pneg %p543_p2 }
  0x63   : > { %v283_v5 = vadd.f32 %v282_v1, %v276_v6  ;;  %p550_p7 = por %p549_p5, %p548_p13 }
  0x64   : > { %v292_v10 = vmax.f32 %v223_v3, %v257_v4 }
  0x65   : > { %v287_v9 = vadd.f32 %v286_v7, %v283_v5  ;;  %p551_p8 = pnand %p550_p7, %p544_p10 }
  0x67   : > { %v291_v11 = vadd.f32 %v290_v8, %v287_v9 }
  0x69   : > { %v293_v13 = vmax.f32 %v292_v10, %v291_v11 }
  0x6b   : > { %v294_v14 = vsub.f32 %v223_v3, %v293_v13  ;;  %v297_v15 = vsub.f32 %v257_v4, %v293_v13  ;;  %v300_v16 = vsub.f32 %v291_v11, %v293_v13 }
  0x6d   : > { %v295_v12 = vmul.f32 1.442695, %v294_v14  ;;  %v298_v17 = vmul.f32 1.442695, %v297_v15  ;;  %v301_v18 = vmul.f32 1.442695, %v300_v16 }
  0x6f   : > { %493 = vpow2.f32 %v295_v12 }
  0x70   : > { %495 = vpow2.f32 %v298_v17 }
  0x71   : > { %497 = vpow2.f32 %v301_v18 }
  0x79   : > { %v494_v19 = vpop.eup %493 }
  0x7a   : > { %v496_v20 = vpop.eup %495 }
  0x7b   : > { %v498_v21 = vpop.eup %497  ;;  %v303_v22 = vadd.f32 %v496_v20, %v494_v19 }
  0x7d   : > { %v304_v23 = vadd.f32 %v498_v21, %v303_v22 }
  0x7f   : > { %499 = vrcp.f32 %v304_v23 }
  0x89   : > { %v500_v24 = vpop.eup %499 }
  0x8a   : > { %v306_v25 = vmul.f32 %v500_v24, %v494_v19  ;;  %v308_v26 = vmul.f32 %v500_v24, %v496_v20  ;;  %v310_v27 = vmul.f32 %v500_v24, %v498_v21 }
  0x8c   : > { %307 = vst [vmem:[%s174_s16] sm:$0x1] %v306_v25  ;;  %309 = vst [vmem:[%s174_s16 + $0x1] sm:$0x1] %v308_v26 }
  0x8d   : > { %311 = vst [vmem:[%s174_s16 + $0x2] sm:$0x1] %v310_v27 }
  0x8e   : > { %554 = shalt.err (!%p551_p8)
}
  0x8f   : > { %s555_s10 = scalar_lea.hbm %s878_s29, 64  ;;  %s559_s15 = scalar_lea.hbm %s923_s3, 128 }
  0x90   : > { %p556_p11 = scmp.ne.s32.totalorder %s878_s29, %s555_s10  ;;  %p560_p4 = scmp.lt.u32.totalorder %s878_s29, %s923_s3 }
  0x91   : > { %p561_p6 = scmp.lt.u32.totalorder %s559_s15, %s555_s10  ;;  %p563_p9 = scmp.lt.u32.totalorder %s555_s10, %s878_s29 }
  0x92   : > { %p557_p12 = pnand %p556_p11, %p935_p1 }
  0x93   : > { %p562_p0 = por %p561_p6, %p560_p4 }
  0x94   : > { %p558_p3 = pneg %p557_p12 }
  0x95   : > { %p564_p2 = por %p563_p9, %p562_p0 }
  0x97   : > { %p565_p10 = pnand %p564_p2, %p558_p3 }
  0x99   : > { %568 = shalt.err (!%p565_p10)
}
  0x9a   : > { %447 = dma.vmem_to_hbm [thread:$0]  (%p935_p1), %s873_s18, 64, %s878_s29, %s313_s20  }
  0x9b PF: > { %s338_s17 = sand.u32 1, %s597_s22   ;;  %p936_p13 = scmp.ne.s32.totalorder %s929_s7, 0 }
  0x9c   : > { %p937_p5 = scmp.ge.s32.totalorder %s609_s25, 2  ;;  %s339_s21 = scalar_lea.sflag [#allocation6], %s338_s17 }
  0x9e   : > { %p454_p7 = pnand %p937_p5, %p936_p13 }
  0xa0   : > { %592 = dma.done.wait (!%p454_p7), %s339_s21, 64  }
  0xa1   : > { %594 = vsyncadd (!%p454_p7), %s339_s21, 4294967232  ;;  %p20_p8 = scmp.ge.s32.totalorder %s672_s27, 4   ;;  %s938_s22 = smov %s601_s23 }
  0xa2   : > { %s939_s23 = smov %s605_s24  ;;  %s940_s24 = smov %s684_s30 }
  0xa3   : > { %s941_s25 = smov %s672_s27  ;;  %22 = sbr.rel (!%p20_p8) target bundleno = 17 (0x11), region = 76 }
  0xaa   :  { %344 = vsyncpa [#allocation5], 1 }
  0xab   :  { %346 = vsyncpa [#allocation5 + $0x1], 1 }
  0xac   :  { %347 = vsyncpa [#allocation6], 1 }
  0xad   :  { %349 = vsyncpa [#allocation6 + $0x1], 1 }

</bundles_post_ra>
